<compile_context>
chip_gen: v5e
topology: v5e:2x2
jax: 0.10.0
libtpu: 0.0.40
codegen_flags: <defaults>
</compile_context>

<pallas_src>
import jax
import jax.numpy as jnp
from jax import lax
from jax.experimental import pallas as pl
from jax.experimental.pallas import tpu as pltpu

# -----------------------------------------------------------------------------
# Network definition (feature sizes from the PyTorch module)
# -----------------------------------------------------------------------------
LAYER_DIMS = [12, 30, 50, 50, 30, 30, 30, 30, 30, 5]   # 9 Linear layers
NUM_LINEAR = len(LAYER_DIMS) - 1                        # = 9
NUM_BN = NUM_LINEAR - 1                                 # BN after all but last
IN_DIM = LAYER_DIMS[0]                                  # = 12
OUT_DIM = LAYER_DIMS[-1]                                # = 5
BN_EPS = 1e-5
LEAKY_SLOPE = 0.01
PAD = 64                                                # padded feature width


def _mlp_kernel(x_ref, w_ref, v_ref, out_ref, xpad_ref):
    """x_ref:   (batch, 12)           raw input (block == full array dims)
       w_ref:   (NUM_LINEAR, PAD, PAD) bf16 weight stack, W[i,:in_i,:out_i]=W_i^T
       v_ref:   (NUM_LINEAR, 2, PAD)   f32: row0 = gamma_i (or final bias),
                                       row1 = beta_i; padded entries are zero
       out_ref: (batch, PAD)           padded output slab (cols >= 5 are zero)
       xpad_ref:(batch, PAD) f32 VMEM scratch used to zero-extend x

    Zero-padded weights and gamma/beta keep the padded columns exactly zero
    through every layer, so the 64-wide pipeline matches the un-padded net.
    """
    batch = x_ref.shape[0]
    inv_batch = 1.0 / batch

    # Zero-extend the 12 input features to the padded width inside the kernel.
    xpad_ref[...] = jnp.zeros_like(xpad_ref)
    xpad_ref[:, 0:IN_DIM] = x_ref[...].astype(jnp.float32)
    h0 = xpad_ref[...]

    def bn_layer(layer, h):
        w = w_ref[layer]                                   # (PAD, PAD) bf16
        h = jnp.dot(h.astype(jnp.bfloat16), w,
                    preferred_element_type=jnp.float32)
        gv = v_ref[layer]                                  # (2, PAD) f32
        gamma = gv[0:1, :]
        beta = gv[1:2, :]
        # One-pass batch statistics (biased variance, training-mode BN),
        # clamped to guard against cancellation going slightly negative.
        s1 = jnp.sum(h, axis=0, keepdims=True)
        s2 = jnp.sum(h * h, axis=0, keepdims=True)
        mean = s1 * inv_batch
        var = jnp.maximum(s2 * inv_batch - mean * mean, 0.0)
        scale = gamma * lax.rsqrt(var + BN_EPS)
        shift = beta - mean * scale
        h = h * scale + shift
        return jnp.maximum(h, LEAKY_SLOPE * h)             # LeakyReLU(0.01)

    # fori_loop bounds live ranges to one layer's weights at a time.
    h = lax.fori_loop(0, NUM_BN, bn_layer, h0)

    # Final Linear (no BN): keep its bias; static index for the last weight.
    w_last = w_ref[NUM_BN]
    bias = v_ref[NUM_BN, 0:1, :]
    h = jnp.dot(h.astype(jnp.bfloat16), w_last,
                preferred_element_type=jnp.float32) + bias

    # Lane-dense store of the full padded slab; real columns sliced outside.
    out_ref[...] = h.astype(out_ref.dtype)


# -----------------------------------------------------------------------------
# Parameter init (PyTorch-default-style) and packing
# -----------------------------------------------------------------------------
def init_params(key):
    """Flat list: W0, b0, g0, beta0, W1, b1, g1, beta1, ..., W8, b8 (f32)."""
    params = []
    for layer in range(NUM_LINEAR):
        fan_in = LAYER_DIMS[layer]
        fan_out = LAYER_DIMS[layer + 1]
        key, kw, kb = jax.random.split(key, 3)
        bound = 1.0 / jnp.sqrt(fan_in)
        # PyTorch Linear weight is (out, in); stored transposed as (in, out).
        w = jax.random.uniform(kw, (fan_in, fan_out), jnp.float32, -bound, bound)
        b = jax.random.uniform(kb, (1, fan_out), jnp.float32, -bound, bound)
        params += [w, b]
        if layer < NUM_BN:
            gamma = jnp.ones((1, fan_out), jnp.float32)
            beta = jnp.zeros((1, fan_out), jnp.float32)
            params += [gamma, beta]
    return params


def pack_params(params):
    """Pack the flat param list into two arrays (one DMA each).

    Weights are stored bf16 (MXU-native; f32 accumulation happens in-kernel).
    Pre-BN Linear biases are dropped: a per-column constant is exactly
    cancelled by the BN mean subtraction; only the final layer's bias is kept.
    """
    w_stack = jnp.zeros((NUM_LINEAR, PAD, PAD), jnp.bfloat16)
    v_stack = jnp.zeros((NUM_LINEAR, 2, PAD), jnp.float32)
    idx = 0
    for layer in range(NUM_LINEAR):
        w, b = params[idx], params[idx + 1]
        idx += 2
        fi, fo = w.shape
        w_stack = w_stack.at[layer, :fi, :fo].set(w.astype(jnp.bfloat16))
        if layer < NUM_BN:
            gamma, beta = params[idx], params[idx + 1]
            idx += 2
            v_stack = v_stack.at[layer, 0, :fo].set(gamma[0])
            v_stack = v_stack.at[layer, 1, :fo].set(beta[0])
        else:
            v_stack = v_stack.at[layer, 0, :fo].set(b[0])
    return w_stack, v_stack


# -----------------------------------------------------------------------------
# Pallas wrapper
# -----------------------------------------------------------------------------
def net_forward(x, w_stack, v_stack):
    batch = x.shape[0]

    def full_spec(a):
        return pl.BlockSpec(a.shape, lambda *_, nd=a.ndim: (0,) * nd)

    out_padded = pl.pallas_call(
        _mlp_kernel,
        out_shape=jax.ShapeDtypeStruct((batch, PAD), jnp.float32),
        grid=(),
        in_specs=[full_spec(x), full_spec(w_stack), full_spec(v_stack)],
        out_specs=pl.BlockSpec((batch, PAD), lambda *_: (0, 0)),
        scratch_shapes=[pltpu.VMEM((batch, PAD), jnp.float32)],
    )(x, w_stack, v_stack)
    # Lane-dense kernel store; the (free) slice to the 5 real columns is here.
    return out_padded[:, :OUT_DIM]


# -----------------------------------------------------------------------------
# Pure-JAX references
# -----------------------------------------------------------------------------
def net_forward_ref(x, params, matmul_dtype=jnp.float32, keep_pre_bn_bias=True):
    """Original math (two-pass variance). With matmul_dtype=bfloat16 and
    keep_pre_bn_bias=False it mirrors the kernel's numerics for a tight check."""
    h = x.astype(jnp.float32)
    idx = 0
    for layer in range(NUM_LINEAR):
        w, b = params[idx], params[idx + 1]
        idx += 2
        h = jnp.dot(h.astype(matmul_dtype), w.astype(matmul_dtype),
                    preferred_element_type=jnp.float32)
        if layer < NUM_BN:
            if keep_pre_bn_bias:
                h = h + b
            gamma, beta = params[idx], params[idx + 1]
            idx += 2
            mean = jnp.mean(h, axis=0, keepdims=True)
            var = jnp.mean((h - mean) ** 2, axis=0, keepdims=True)
            h = (h - mean) / jnp.sqrt(var + BN_EPS) * gamma + beta
            h = jnp.where(h > 0, h, LEAKY_SLOPE * h)
        else:
            h = h + b
    return h


if __name__ == "__main__":
    key = jax.random.PRNGKey(0)
    key, kx = jax.random.split(key)

    batch = 16
    x = jax.random.normal(kx, (batch, IN_DIM), jnp.float32)

    params = init_params(key)
    w_stack, v_stack = pack_params(params)

    out = net_forward(x, w_stack, v_stack)
    out = jax.block_until_ready(out)
    assert out.shape == (batch, OUT_DIM), out.shape
    assert bool(jnp.all(jnp.isfinite(out)))

    # Tight check against a bf16-matched reference (isolates structural rewrites).
    ref_bf16 = net_forward_ref(x, params, matmul_dtype=jnp.bfloat16,
                               keep_pre_bn_bias=False)
    assert jnp.allclose(out, ref_bf16, atol=1e-2, rtol=1e-2), (
        float(jnp.max(jnp.abs(out - ref_bf16)))
    )

    # Looser check against the exact f32 original math (bf16 matmul inputs
    # accumulate ~1e-2-scale differences over the 9-layer chain).
    ref_f32 = net_forward_ref(x, params)
    assert jnp.allclose(out, ref_f32, atol=0.1, rtol=0.1), (
        float(jnp.max(jnp.abs(out - ref_f32)))
    )

    print("KERNEL_OK")
</pallas_src>

<mosaic_0001>
module attributes {stable_mosaic.version = 11 : i64} {
  func.func @_mlp_kernel(%arg0: memref<16x12xf32, #tpu.memory_space<vmem>>, %arg1: memref<9x64x64xbf16, #tpu.memory_space<vmem>>, %arg2: memref<9x2x64xf32, #tpu.memory_space<vmem>>, %arg3: memref<16x64xf32, #tpu.memory_space<vmem>>, %arg4: memref<16x64xf32, #tpu.memory_space<vmem>>) attributes {dimension_semantics = [], scalar_prefetch = 0 : i64, scratch_operands = 1 : i64, tpu.core_type = #tpu.core_type<tc>} {
    %cst = arith.constant 0.000000e+00 : f32
    %0 = vector.broadcast %cst : f32 to vector<16x64xf32>
    %c0 = arith.constant 0 : index
    %c0_0 = arith.constant 0 : index
    %1 = vector.load %arg4[%c0, %c0_0] : memref<16x64xf32, #tpu.memory_space<vmem>>, vector<16x64xf32>
    tpu.vector_store %arg4[%c0, %c0_0], %0 {strides = array<i32>} : memref<16x64xf32, #tpu.memory_space<vmem>>, vector<16x64xf32>,
    %c0_1 = arith.constant 0 : index
    %c0_2 = arith.constant 0 : index
    %2 = vector.load %arg0[%c0_1, %c0_2] : memref<16x12xf32, #tpu.memory_space<vmem>>, vector<16x12xf32>
    %c0_3 = arith.constant 0 : index
    %c0_4 = arith.constant 0 : index
    %3 = vector.load %arg4[%c0_3, %c0_4] : memref<16x64xf32, #tpu.memory_space<vmem>>, vector<16x12xf32>
    tpu.vector_store %arg4[%c0_3, %c0_4], %2 {strides = array<i32>} : memref<16x64xf32, #tpu.memory_space<vmem>>, vector<16x12xf32>,
    %c0_5 = arith.constant 0 : index
    %c0_6 = arith.constant 0 : index
    %4 = vector.load %arg4[%c0_5, %c0_6] : memref<16x64xf32, #tpu.memory_space<vmem>>, vector<16x64xf32>
    %c0_i32 = arith.constant 0 : i32
    %c8_i32 = arith.constant 8 : i32
    %5 = arith.addi %c0_i32, %c8_i32 : i32
    %c1_i32 = arith.constant 1 : i32
    %6 = scf.for %arg5 = %c0_i32 to %5 step %c1_i32 iter_args(%arg6 = %4) -> (vector<16x64xf32>)  : i32 {
      %16 = arith.index_cast %arg5 : i32 to index
      %c0_16 = arith.constant 0 : index
      %c0_17 = arith.constant 0 : index
      %17 = vector.load %arg1[%16, %c0_16, %c0_17] : memref<9x64x64xbf16, #tpu.memory_space<vmem>>, vector<1x64x64xbf16>
      %18 = vector.shape_cast %17 : vector<1x64x64xbf16> to vector<64x64xbf16>
      %19 = arith.truncf %arg6 : vector<16x64xf32> to vector<16x64xbf16>
      %cst_18 = arith.constant dense<0.000000e+00> : vector<16x64xf32>
      %20 = tpu.matmul %19, %18, %cst_18 {dimension_numbers = #tpu.dot_dimension_numbers<[1], [0], [0], [1], [0, 0, 1, 1], [], []>} : vector<16x64xbf16>, vector<64x64xbf16>, vector<16x64xf32> -> vector<16x64xf32>
      %21 = arith.index_cast %arg5 : i32 to index
      %c0_19 = arith.constant 0 : index
      %c0_20 = arith.constant 0 : index
      %22 = vector.load %arg2[%21, %c0_19, %c0_20] : memref<9x2x64xf32, #tpu.memory_space<vmem>>, vector<1x2x64xf32>
      %23 = vector.shape_cast %22 : vector<1x2x64xf32> to vector<2x64xf32>
      %24 = vector.extract_strided_slice %23 {offsets = [0, 0], sizes = [1, 64], strides = [1, 1]} : vector<2x64xf32> to vector<1x64xf32>
      %25 = vector.extract_strided_slice %23 {offsets = [1, 0], sizes = [1, 64], strides = [1, 1]} : vector<2x64xf32> to vector<1x64xf32>
      %cst_21 = arith.constant dense<0.000000e+00> : vector<64xf32>
      %26 = vector.multi_reduction <add>, %20, %cst_21 [0] : vector<16x64xf32> to vector<64xf32>
      %27 = vector.shape_cast %26 : vector<64xf32> to vector<1x64xf32>
      %28 = arith.mulf %20, %20 : vector<16x64xf32>
      %cst_22 = arith.constant dense<0.000000e+00> : vector<64xf32>
      %29 = vector.multi_reduction <add>, %28, %cst_22 [0] : vector<16x64xf32> to vector<64xf32>
      %30 = vector.shape_cast %29 : vector<64xf32> to vector<1x64xf32>
      %cst_23 = arith.constant 6.250000e-02 : f32
      %31 = vector.broadcast %cst_23 : f32 to vector<1x64xf32>
      %32 = arith.mulf %27, %31 : vector<1x64xf32>
      %cst_24 = arith.constant 6.250000e-02 : f32
      %33 = vector.broadcast %cst_24 : f32 to vector<1x64xf32>
      %34 = arith.mulf %30, %33 : vector<1x64xf32>
      %35 = arith.mulf %32, %32 : vector<1x64xf32>
      %36 = arith.subf %34, %35 : vector<1x64xf32>
      %cst_25 = arith.constant 0.000000e+00 : f32
      %37 = vector.broadcast %cst_25 : f32 to vector<1x64xf32>
      %38 = arith.maximumf %36, %37 : vector<1x64xf32>
      %cst_26 = arith.constant 9.99999974E-6 : f32
      %39 = vector.broadcast %cst_26 : f32 to vector<1x64xf32>
      %40 = arith.addf %38, %39 : vector<1x64xf32>
      %41 = math.rsqrt %40 : vector<1x64xf32>
      %42 = arith.mulf %24, %41 : vector<1x64xf32>
      %43 = arith.mulf %32, %42 : vector<1x64xf32>
      %44 = arith.subf %25, %43 : vector<1x64xf32>
      %45 = vector.broadcast %42 : vector<1x64xf32> to vector<16x64xf32>
      %46 = arith.mulf %20, %45 : vector<16x64xf32>
      %47 = vector.broadcast %44 : vector<1x64xf32> to vector<16x64xf32>
      %48 = arith.addf %46, %47 : vector<16x64xf32>
      %cst_27 = arith.constant 0.00999999977 : f32
      %49 = vector.broadcast %cst_27 : f32 to vector<16x64xf32>
      %50 = arith.mulf %49, %48 : vector<16x64xf32>
      %51 = arith.maximumf %48, %50 : vector<16x64xf32>
      scf.yield %51 : vector<16x64xf32>
    }
    %c8_i32_7 = arith.constant 8 : i32
    %c8 = arith.constant 8 : index
    %c0_8 = arith.constant 0 : index
    %c0_9 = arith.constant 0 : index
    %7 = vector.load %arg1[%c8, %c0_8, %c0_9] : memref<9x64x64xbf16, #tpu.memory_space<vmem>>, vector<1x64x64xbf16>
    %8 = vector.shape_cast %7 : vector<1x64x64xbf16> to vector<64x64xbf16>
    %c8_10 = arith.constant 8 : index
    %c0_11 = arith.constant 0 : index
    %c0_12 = arith.constant 0 : index
    %9 = vector.load %arg2[%c8_10, %c0_11, %c0_12] : memref<9x2x64xf32, #tpu.memory_space<vmem>>, vector<1x1x64xf32>
    %10 = vector.shape_cast %9 : vector<1x1x64xf32> to vector<1x64xf32>
    %11 = arith.truncf %6 : vector<16x64xf32> to vector<16x64xbf16>
    %cst_13 = arith.constant dense<0.000000e+00> : vector<16x64xf32>
    %12 = tpu.matmul %11, %8, %cst_13 {dimension_numbers = #tpu.dot_dimension_numbers<[1], [0], [0], [1], [0, 0, 1, 1], [], []>} : vector<16x64xbf16>, vector<64x64xbf16>, vector<16x64xf32> -> vector<16x64xf32>
    %13 = vector.broadcast %10 : vector<1x64xf32> to vector<16x64xf32>
    %14 = arith.addf %12, %13 : vector<16x64xf32>
    %c0_14 = arith.constant 0 : index
    %c0_15 = arith.constant 0 : index
    %15 = vector.load %arg3[%c0_14, %c0_15] : memref<16x64xf32, #tpu.memory_space<vmem>>, vector<16x64xf32>
    tpu.vector_store %arg3[%c0_14, %c0_15], %14 {strides = array<i32>} : memref<16x64xf32, #tpu.memory_space<vmem>>, vector<16x64xf32>,
    return
  }
}

</mosaic_0001>

<bundles_post_ra>
// kernel: tpu_custom_call.1
= control target key start
LH: loop header
LB: loop body
LE: loop exit
PB: predicated region body
PF: predicated region fallthrough
CT: control target
= control target key end

     0   :  { %8 = vsyncpa [#allocation4], 0  ;;  %s569_s0 = inlined_call_operand.hbm [shape: f32[16,12], index: 0, kind: input, shape index: {}]   ;;  %s570_s1 = inlined_call_operand.hbm [shape: bf16[9,64,64], index: 1, kind: input, shape index: {}]   ;;  %s571_s2 = inlined_call_operand.hbm [shape: f32[9,2,64], index: 2, kind: input, shape index: {}]   ;;  %s572_s3 = inlined_call_operand.hbm [shape: f32[16,64], index: 3, kind: output, shape index: {}]  }
   0x1   :  { %9 = vsyncpa [#allocation7], 0  ;;  %s28_s14 = sshll.u32 %s570_s1, 4  ;;  %s29_s14 = int_to_ptr.hbm [resolvable:$true] %s28_s14 }
   0x2   :  { %10 = vsyncpa [#allocation5], 0  ;;  %s490_s15 = smov [#allocation6]   ;;  %s15_s19 = sshll.u32 %s569_s0, 4  ;;  %s16_s19 = int_to_ptr.hbm [resolvable:$true] %s15_s19 }
   0x3   :  { %s30_s16 = sshll.u32 %s490_s15, 4  ;;  %s491_s20 = smov 64   ;;  %s31_s16 = int_to_ptr.vmem [resolvable:$true] %s30_s16 }
   0x4   :  { %s492_s21 = smov 4   ;;  %s493_s22 = smov [#allocation3]  }
   0x5   :  { %36 = dma.hbm_to_vmem [thread:$0]  %s29_s14, 4608, %s31_s16, [#allocation7], %s491_s20, %s491_s20, %s492_s21  }
   0x6   :  { %s17_s23 = sshll.u32 %s493_s22, 4  ;;  %s494_s24 = smov 128   ;;  %s18_s23 = int_to_ptr.vmem [resolvable:$true] %s17_s23 }
   0x7   :  { %s495_s25 = smov 8   ;;  %s41_s27 = sshll.u32 %s571_s2, 4  ;;  %s42_s27 = int_to_ptr.hbm [resolvable:$true] %s41_s27 }
   0x8   :  { %23 = dma.hbm_to_vmem [thread:$0]  %s16_s19, 256, %s18_s23, [#allocation4], %s494_s24, %s494_s24, %s495_s25  }
   0x9   :  { %s496_s28 = smov [#allocation8]   ;;  %s497_s29 = smov 32  }
   0xa   :  { %s43_s0 = sshll.u32 %s496_s28, 4  ;;  %s498_s30 = smov 2   ;;  %s44_s0 = int_to_ptr.vmem [resolvable:$true] %s43_s0 }
   0xb   :  { %49 = dma.hbm_to_vmem [thread:$0]  %s42_s27, 288, %s44_s0, [#allocation7], %s497_s29, %s497_s29, %s498_s30  }
   0xc   :  { %472 = dma.done.wait [#allocation4], 256  }
   0xd   :  { %473 = vsyncadd [#allocation4], 4294967040 }
   0xe   :  { %474 = dma.done.wait [#allocation7], 4896  }
   0xf   :  { %475 = vsyncadd [#allocation7], 4294962400  ;;  %vm63_vm0 = vcmask 523264   ;;  %v499_v0 = vmov 0.0   ;;  %vm68_vm1 = vcmask 97280   ;;  %v66_v1 = vld [vmem:[#allocation3] sm:$0xff] }
  0x10   :  { %64 = vst.msk [vmem:[#allocation2] sm:$0xff] %vm63_vm0, %v499_v0  ;;  %v67_v2 = vld [vmem:[#allocation3 + $0x8] sm:$0xff]  ;;  %s539_s2 = smov 0  }
  0x11   :  { %65 = vst.msk [vmem:[#allocation2 + $0x8] sm:$0xff] %vm63_vm0, %v499_v0 }
  0x12   :  { %69 = vst.msk [vmem:[#allocation2] sm:$0xff] %vm68_vm1, %v66_v1 }
  0x13   :  { %70 = vst.msk [vmem:[#allocation2 + $0x8] sm:$0xff] %vm68_vm1, %v67_v2 }
  0x19   :  { %v71_v3 = vld [vmem:[#allocation2] sm:$0xff]  }
  0x1a   :  { %v72_v4 = vld [vmem:[#allocation2 + $0x8] sm:$0xff]  }
  0x1b LB: > { %s317_s4 = sshll.u32 %s488_s2, 5  ;;  %v92_v9 = vpack.c.bf16 %v480_v4, %v484_v3  ;;  %s299_s6 = sshll.u32 %s488_s2, 1  ;;  %s488_s2 = sphi %s539_s2, %s78_s2   ;;  %v484_v3 = vphi %v71_v3, %v574_v3   ;;  %v480_v4 = vphi %v72_v4, %v573_v4  }
  0x1c   : > { %s83_s5 = scalar_lea.vmem [#allocation6], %s317_s4  ;;  %s135_s7 = scalar_lea.vmem [#allocation8], %s299_s6 }
  0x1d   : > { %v321_v5 = vld [vmem:[%s83_s5 + $0x18] sm:$0xff]  ;;  %v320_v6 = vld [vmem:[%s83_s5 + $0x10] sm:$0xff]  ;;  %v319_v7 = vld [vmem:[%s83_s5 + $0x8] sm:$0xff]  ;;  %s78_s2 = sadd.s32 1, %s488_s2  }
  0x1e   : > { %124 = vmatpush.bf16.msra.mxu0 %v321_v5  ;;  %v318_v8 = vld [vmem:[%s83_s5] sm:$0xff]  ;;  %p75_p0 = scmp.ge.s32.totalorder %s78_s2, 8  }
  0x1f   : > { %v136_v43 = vld [vmem:[%s135_s7] sm:$0x3]  ;;  %v325_v60 = vld [vmem:[#allocation6 + $0x118] sm:$0xff] (%p75_p0)  ;;  %v324_v61 = vld [vmem:[#allocation6 + $0x110] sm:$0xff] (%p75_p0)  ;;  %s500_s8 = smov (%p75_p0), [#allocation9]   ;;  %s251_s12 = sshll.u32 (%p75_p0), %s572_s3, 4  ;;  %s252_s12 = int_to_ptr.hbm [resolvable:$true] %s251_s12 }
  0x20   :  { %v323_v62 = vld [vmem:[#allocation6 + $0x108] sm:$0xff] (%p75_p0)  ;;  %v322_v63 = vld [vmem:[#allocation6 + $0x100] sm:$0xff] (%p75_p0)  ;;  %v363_v1 = vld [vmem:[#allocation8 + $0x10] ss:$0 sm:$0xff] (%p75_p0)  ;;  %s249_s9 = sshll.u32 (%p75_p0), %s500_s8, 4  ;;  %s250_s9 = int_to_ptr.vmem [resolvable:$true] %s249_s9 }
  0x22   : > { %125 = vmatpush.bf16.msra.mxu0 %v320_v6 }
  0x26   : > { %126 = vmatpush.bf16.msra.mxu0 %v319_v7 }
  0x2a   : > { %127 = vmatpush.bf16.msra.mxu0 %v318_v8 }
  0x2d   : > { %298 = vmatmul.msk.bf16.vlgmr.msra.gmra.mxu0 %vm63_vm0, %v92_v9 }
  0x2e   :  { %233 = vmatpush.bf16.msra.mxu0 (%p75_p0), %v325_v60 }
  0x32   :  { %234 = vmatpush.bf16.msra.mxu0 (%p75_p0), %v324_v61 }
  0x36   :  { %235 = vmatpush.bf16.msra.mxu0 (%p75_p0), %v323_v62 }
  0x3a   :  { %236 = vmatpush.bf16.msra.mxu0 (%p75_p0), %v322_v63 }
  0xaa   : > { %v129_v10 = vpop.f32.mrf.mxu0 }
  0xab   : > { %v146_v11 = vmul.f32 %v129_v10, %v129_v10  ;;  %v137_v13 = vsel %vm63_vm0, %v129_v10, 0.0 }
  0xad   : > { %v148_v17 = vsel %vm63_vm0, %v146_v11, 0.0 }
  0xb2   : > { %v131_v12 = vpop.f32.mrf.mxu0 }
  0xb3   : > { %v138_v14 = vsel %vm63_vm0, %v131_v12, 0.0  ;;  %v147_v15 = vmul.f32 %v131_v12, %v131_v12 }
  0xb4   : > { %v139_v16 = vadd.f32 %v138_v14, %v137_v13 }
  0xb5   : > { %v149_v18 = vsel %vm63_vm0, %v147_v15, 0.0 }
  0xb6   : > { %v140_v19 = vrot.slane %v139_v16, 4  ;;  %v150_v20 = vadd.f32 %v149_v18, %v148_v17 }
  0xb8   : > { %v141_v21 = vadd.f32 %v140_v19, %v139_v16  ;;  %v151_v22 = vrot.slane %v150_v20, 4 }
  0xba   : > { %v142_v23 = vrot.slane %v141_v21, 2  ;;  %v152_v24 = vadd.f32 %v151_v22, %v150_v20 }
  0xbc   : > { %v143_v25 = vadd.f32 %v142_v23, %v141_v21  ;;  %v153_v26 = vrot.slane %v152_v24, 2 }
  0xbe   : > { %v144_v27 = vrot.slane %v143_v25, 1  ;;  %v154_v28 = vadd.f32 %v153_v26, %v152_v24 }
  0xc0   : > { %v145_v29 = vadd.f32 %v144_v27, %v143_v25  ;;  %v155_v30 = vrot.slane %v154_v28, 1 }
  0xc2   : > { %v156_v31 = vadd.f32 %v155_v30, %v154_v28  ;;  %v157_v32 = vmul.f32 0.0625, %v145_v29 }
  0xc4   : > { %v158_v33 = vmul.f32 0.0625, %v156_v31  ;;  %v159_v34 = vmul.f32 %v157_v32, %v157_v32 }
  0xc6   : > { %v160_v35 = vsub.f32 %v158_v33, %v159_v34 }
  0xc8   : > { %v161_v36 = vmax.f32 %v160_v35, 0.0 }
  0xca   : > { %v162_v37 = vadd.f32 1e-05, %v161_v36 }
  0xcc   : > { %361 = vrsqrt.f32 %v162_v37  ;;  %vm169_vm3 = vweird.f32 %v162_v37 }
  0xd2   : > { %v362_v38 = vpop.eup %361 }
  0xd3   : > { %v164_v39 = vmul.f32 %v362_v38, %v162_v37  ;;  %vm170_vm2 = vweird.f32 %v362_v38 }
  0xd4   : > { %vm171_vm4 = vmor %vm169_vm3, %vm170_vm2 }
  0xd5   : > { %v165_v40 = vmul.f32 %v362_v38, %v164_v39 }
  0xd7   : > { %v166_v41 = vmul.f32 0.5, %v165_v40 }
  0xd9   : > { %v167_v42 = vsub.f32 1.5, %v166_v41 }
  0xdb   : > { %v168_v44 = vmul.f32 %v362_v38, %v167_v42 }
  0xdd   : > { %v172_v45 = vsel %vm171_vm4, %v362_v38, %v168_v44 }
  0xde   : > { %v173_v46 = vmul.f32 %v172_v45, %v136_v43 }
  0xe0   : > { %v174_v47 = vmul.f32 %v173_v46, %v157_v32  ;;  %v179_v49 = vperm.slane %v173_v46, 0 }
  0xe2   : > { %v176_v48 = vrot.slane %v174_v47, 7  ;;  %v180_v51 = vmul.f32 %v179_v49, %v129_v10  ;;  %v181_v52 = vmul.f32 %v179_v49, %v131_v12 }
  0xe4   : > { %v178_v50 = vsub.f32 %v136_v43, %v176_v48 }
  0xe6   : > { %v182_v53 = vperm.slane %v178_v50, 1 }
  0xe8   : > { %v183_v54 = vadd.f32 %v182_v53, %v180_v51  ;;  %v184_v55 = vadd.f32 %v182_v53, %v181_v52 }
  0xea   : > { %v185_v56 = vmul.f32 0.01, %v183_v54  ;;  %v186_v57 = vmul.f32 0.01, %v184_v55  ;;  %77 = sbr.rel (!%p75_p0) target bundleno = 27 (0x1b), region = 55 }
  0xec   : > { %v187_v58 = vmax.f32 %v183_v54, %v185_v56   ;;  %v188_v59 = vmax.f32 %v184_v55, %v186_v57  }
  0xee   : > { %v573_v4 = vmov %v188_v59  ;;  %v574_v3 = vmov %v187_v58  ;;  %v200_v0 = vpack.c.bf16 (%p75_p0), %v188_v59, %v187_v58 }
  0xf0   :  { %316 = vmatmul.msk.bf16.vlgmr.msra.gmra.mxu0 %vm63_vm0, %v200_v0 }
 0x16d   :  { %v238_v2 = vpop.f32.mrf.mxu0 }
 0x16e   :  { %v239_v3 = vadd.f32 %v363_v1, %v238_v2 }
 0x170   :  { %243 = vst.msk [vmem:[#allocation9] sm:$0xff] %vm63_vm0, %v239_v3 }
 0x175   :  { %v240_v4 = vpop.f32.mrf.mxu0 }
 0x176   :  { %v241_v5 = vadd.f32 %v363_v1, %v240_v4 }
 0x178   :  { %244 = vst.msk [vmem:[#allocation9 + $0x8] sm:$0xff] %vm63_vm0, %v241_v5 }
 0x179   :  { %257 = dma.vmem_to_hbm [thread:$0]  %s250_s9, 256, %s252_s12, [#allocation5], %s494_s24, %s494_s24, %s495_s25  }
 0x17a   :  { %476 = dma.done.wait [#allocation5], 256  }
 0x17b   :  { %477 = vsyncadd [#allocation5], 4294967040 }
 0x17c   :  { %262 = vsyncpa [#allocation4], 1 }
 0x17d   :  { %263 = vsyncpa [#allocation7], 1 }
 0x17e   :  { %264 = vsyncpa [#allocation5], 1 }

</bundles_post_ra>
